<compile_context>
chip_gen: v7x
topology: tpu7x:2x2x1
jax: 0.10.0
libtpu: 0.0.40
codegen_flags: <defaults>
</compile_context>

<pallas_src>
import functools

import jax
import jax.numpy as jnp
from jax.experimental import pallas as pl
from jax.experimental.pallas import tpu as pltpu


def _patch_embed_kernel(x_ref, o_ref, *, hb, p1, p2, w, C):
    # x_ref block: (1, C, hb*p1, W)  -- hb consecutive patch rows of one image (NCHW)
    # o_ref block: (1, hb*w, P)      -- their patches, lane-dense 'p1 p2 c' features
    row_blocks = []
    for r in range(hb):                              # static unroll, hb is small
        lane_chunks = []
        for i in range(p1):                          # static unroll, p1 is small
            rows = x_ref[0, :, r * p1 + i, :]        # (C, W): pixel row i of patch row r
            rt = rows.T                              # (W, C): channel -> lanes (2-D xpose)
            rt = rt.reshape(w, p2, C)                # split W into (patch col, in-patch col)
            # flatten (p2, C) into lanes in 'j*C + c' order
            lane_chunks.extend(rt[:, j, :] for j in range(p2))
        # (w, p1*p2*C): lane order (i, j, c) == einops 'p1 p2 c'
        row_blocks.append(jnp.concatenate(lane_chunks, axis=-1))
    # (hb*w, P): one full-width, unmasked store per grid step
    o_ref[0] = jnp.concatenate(row_blocks, axis=0)


def _choose_rows_per_step(B, h, w, p1, bytes_per_patch_row,
                          target_bytes=1 << 20, min_steps=4):
    """Pick how many patch rows (hb) to pack into one grid step.

    Constraints: hb divides h; second-to-last dims of the input block (hb*p1, W)
    and output block (hb*w, P) are 8-aligned (or equal the full extent); block
    stays under ~1 MiB so the double-buffered in+out footprint (~4x) fits the
    default scoped VMEM on every TPU generation (incl. v7x's 64 MiB physical);
    and, when possible, >= min_steps grid steps remain for megacore sharding.
    """
    candidates = [hb for hb in range(1, h + 1)
                  if h % hb == 0
                  and ((hb * w) % 8 == 0 or hb == h)
                  and ((hb * p1) % 8 == 0 or hb == h)]
    if not candidates:
        return h
    best = candidates[0]
    for hb in candidates:
        if hb * bytes_per_patch_row > target_bytes:
            break
        if B * (h // hb) >= min_steps or hb == candidates[0]:
            best = hb
    return best


def patch_embed(x, patch_size):
    """x: (B, C, H, W) -> (B, N, p1*p2*C), matching the PyTorch rearrange."""
    p1, p2 = patch_size
    B, C, H, W = x.shape
    if H % p1 != 0 or W % p2 != 0:
        raise ValueError(
            f"Image dimensions ({(H, W)}) must be divisible by the patch "
            f"dimensions ({(p1, p2)}).")
    h, w = H // p1, W // p2
    N = h * w
    P = p1 * p2 * C

    itemsize = jnp.dtype(x.dtype).itemsize
    bytes_per_patch_row = w * P * itemsize           # same for input and output
    hb = _choose_rows_per_step(B, h, w, p1, bytes_per_patch_row)

    kernel = functools.partial(_patch_embed_kernel, hb=hb, p1=p1, p2=p2, w=w, C=C)

    return pl.pallas_call(
        kernel,
        out_shape=jax.ShapeDtypeStruct((B, N, P), x.dtype),
        grid=(B, h // hb),
        in_specs=[
            # hb patch rows = hb*p1 image rows, all channels, full width.
            pl.BlockSpec((1, C, hb * p1, W), lambda b, hi: (b, 0, hi, 0)),
        ],
        # Lane-dense output slab: last dim is the full P, one block per step.
        out_specs=pl.BlockSpec((1, hb * w, P), lambda b, hi: (b, hi, 0)),
        compiler_params=pltpu.CompilerParams(
            dimension_semantics=("parallel", "parallel"),
            vmem_limit_bytes=32 << 20,   # blocks are <= ~1 MiB, so plenty on all gens
        ),
    )(x)


def _reference(x, patch_size):
    """Pure-JAX reference of the einops rearrange for validation."""
    p1, p2 = patch_size
    B, C, H, W = x.shape
    h, w = H // p1, W // p2
    return (x.reshape(B, C, h, p1, w, p2)
             .transpose(0, 2, 4, 3, 5, 1)
             .reshape(B, h * w, p1 * p2 * C))


if __name__ == "__main__":
    # img_size=(16,16), patch_size=(4,4), in_chans=4 (embed_dim unused by forward)
    B, C, H, W = 2, 4, 16, 16
    patch_size = (4, 4)

    key = jax.random.PRNGKey(0)
    x = jax.random.normal(key, (B, C, H, W), dtype=jnp.float32)

    out = patch_embed(x, patch_size)
    out = jax.block_until_ready(out)

    ref = _reference(x, patch_size)
    assert out.shape == ref.shape, (out.shape, ref.shape)
    assert jnp.allclose(out, ref), "Pallas PatchEmbed mismatch vs reference"

    print("KERNEL_OK")
</pallas_src>

<mosaic_0001>
module attributes {stable_mosaic.version = 11 : i64} {
  func.func @_patch_embed_kernel(%arg0: i32, %arg1: i32, %arg2: memref<1x4x8x16xf32, #tpu.memory_space<vmem>>, %arg3: memref<1x8x64xf32, #tpu.memory_space<vmem>>) attributes {dimension_semantics = [#tpu.dimension_semantics<parallel>, #tpu.dimension_semantics<parallel>], iteration_bounds = array<i64: 2, 2>, scalar_prefetch = 0 : i64, scratch_operands = 0 : i64, tpu.core_type = #tpu.core_type<tc>, window_params = [{transform_indices = @transform_0, window_bounds = array<i64: 1, 4, 8, 16>}, {transform_indices = @transform_1, window_bounds = array<i64: 1, 8, 64>}]} {
    %c0 = arith.constant 0 : index
    %c0_0 = arith.constant 0 : index
    %c0_1 = arith.constant 0 : index
    %c0_2 = arith.constant 0 : index
    %0 = vector.load %arg2[%c0, %c0_0, %c0_1, %c0_2] : memref<1x4x8x16xf32, #tpu.memory_space<vmem>>, vector<1x4x1x16xf32>
    %1 = vector.shape_cast %0 : vector<1x4x1x16xf32> to vector<4x16xf32>
    %2 = tpu.transpose %1, [1, 0] : vector<4x16xf32> -> vector<16x4xf32>
    %3 = vector.shape_cast %2 : vector<16x4xf32> to vector<4x4x4xf32>
    %4 = vector.extract_strided_slice %3 {offsets = [0, 0, 0], sizes = [4, 1, 4], strides = [1, 1, 1]} : vector<4x4x4xf32> to vector<4x1x4xf32>
    %5 = vector.shape_cast %4 : vector<4x1x4xf32> to vector<4x4xf32>
    %6 = vector.extract_strided_slice %3 {offsets = [0, 1, 0], sizes = [4, 1, 4], strides = [1, 1, 1]} : vector<4x4x4xf32> to vector<4x1x4xf32>
    %7 = vector.shape_cast %6 : vector<4x1x4xf32> to vector<4x4xf32>
    %8 = vector.extract_strided_slice %3 {offsets = [0, 2, 0], sizes = [4, 1, 4], strides = [1, 1, 1]} : vector<4x4x4xf32> to vector<4x1x4xf32>
    %9 = vector.shape_cast %8 : vector<4x1x4xf32> to vector<4x4xf32>
    %10 = vector.extract_strided_slice %3 {offsets = [0, 3, 0], sizes = [4, 1, 4], strides = [1, 1, 1]} : vector<4x4x4xf32> to vector<4x1x4xf32>
    %11 = vector.shape_cast %10 : vector<4x1x4xf32> to vector<4x4xf32>
    %c0_3 = arith.constant 0 : index
    %c0_4 = arith.constant 0 : index
    %c1 = arith.constant 1 : index
    %c0_5 = arith.constant 0 : index
    %12 = vector.load %arg2[%c0_3, %c0_4, %c1, %c0_5] : memref<1x4x8x16xf32, #tpu.memory_space<vmem>>, vector<1x4x1x16xf32>
    %13 = vector.shape_cast %12 : vector<1x4x1x16xf32> to vector<4x16xf32>
    %14 = tpu.transpose %13, [1, 0] : vector<4x16xf32> -> vector<16x4xf32>
    %15 = vector.shape_cast %14 : vector<16x4xf32> to vector<4x4x4xf32>
    %16 = vector.extract_strided_slice %15 {offsets = [0, 0, 0], sizes = [4, 1, 4], strides = [1, 1, 1]} : vector<4x4x4xf32> to vector<4x1x4xf32>
    %17 = vector.shape_cast %16 : vector<4x1x4xf32> to vector<4x4xf32>
    %18 = vector.extract_strided_slice %15 {offsets = [0, 1, 0], sizes = [4, 1, 4], strides = [1, 1, 1]} : vector<4x4x4xf32> to vector<4x1x4xf32>
    %19 = vector.shape_cast %18 : vector<4x1x4xf32> to vector<4x4xf32>
    %20 = vector.extract_strided_slice %15 {offsets = [0, 2, 0], sizes = [4, 1, 4], strides = [1, 1, 1]} : vector<4x4x4xf32> to vector<4x1x4xf32>
    %21 = vector.shape_cast %20 : vector<4x1x4xf32> to vector<4x4xf32>
    %22 = vector.extract_strided_slice %15 {offsets = [0, 3, 0], sizes = [4, 1, 4], strides = [1, 1, 1]} : vector<4x4x4xf32> to vector<4x1x4xf32>
    %23 = vector.shape_cast %22 : vector<4x1x4xf32> to vector<4x4xf32>
    %c0_6 = arith.constant 0 : index
    %c0_7 = arith.constant 0 : index
    %c2 = arith.constant 2 : index
    %c0_8 = arith.constant 0 : index
    %24 = vector.load %arg2[%c0_6, %c0_7, %c2, %c0_8] : memref<1x4x8x16xf32, #tpu.memory_space<vmem>>, vector<1x4x1x16xf32>
    %25 = vector.shape_cast %24 : vector<1x4x1x16xf32> to vector<4x16xf32>
    %26 = tpu.transpose %25, [1, 0] : vector<4x16xf32> -> vector<16x4xf32>
    %27 = vector.shape_cast %26 : vector<16x4xf32> to vector<4x4x4xf32>
    %28 = vector.extract_strided_slice %27 {offsets = [0, 0, 0], sizes = [4, 1, 4], strides = [1, 1, 1]} : vector<4x4x4xf32> to vector<4x1x4xf32>
    %29 = vector.shape_cast %28 : vector<4x1x4xf32> to vector<4x4xf32>
    %30 = vector.extract_strided_slice %27 {offsets = [0, 1, 0], sizes = [4, 1, 4], strides = [1, 1, 1]} : vector<4x4x4xf32> to vector<4x1x4xf32>
    %31 = vector.shape_cast %30 : vector<4x1x4xf32> to vector<4x4xf32>
    %32 = vector.extract_strided_slice %27 {offsets = [0, 2, 0], sizes = [4, 1, 4], strides = [1, 1, 1]} : vector<4x4x4xf32> to vector<4x1x4xf32>
    %33 = vector.shape_cast %32 : vector<4x1x4xf32> to vector<4x4xf32>
    %34 = vector.extract_strided_slice %27 {offsets = [0, 3, 0], sizes = [4, 1, 4], strides = [1, 1, 1]} : vector<4x4x4xf32> to vector<4x1x4xf32>
    %35 = vector.shape_cast %34 : vector<4x1x4xf32> to vector<4x4xf32>
    %c0_9 = arith.constant 0 : index
    %c0_10 = arith.constant 0 : index
    %c3 = arith.constant 3 : index
    %c0_11 = arith.constant 0 : index
    %36 = vector.load %arg2[%c0_9, %c0_10, %c3, %c0_11] : memref<1x4x8x16xf32, #tpu.memory_space<vmem>>, vector<1x4x1x16xf32>
    %37 = vector.shape_cast %36 : vector<1x4x1x16xf32> to vector<4x16xf32>
    %38 = tpu.transpose %37, [1, 0] : vector<4x16xf32> -> vector<16x4xf32>
    %39 = vector.shape_cast %38 : vector<16x4xf32> to vector<4x4x4xf32>
    %40 = vector.extract_strided_slice %39 {offsets = [0, 0, 0], sizes = [4, 1, 4], strides = [1, 1, 1]} : vector<4x4x4xf32> to vector<4x1x4xf32>
    %41 = vector.shape_cast %40 : vector<4x1x4xf32> to vector<4x4xf32>
    %42 = vector.extract_strided_slice %39 {offsets = [0, 1, 0], sizes = [4, 1, 4], strides = [1, 1, 1]} : vector<4x4x4xf32> to vector<4x1x4xf32>
    %43 = vector.shape_cast %42 : vector<4x1x4xf32> to vector<4x4xf32>
    %44 = vector.extract_strided_slice %39 {offsets = [0, 2, 0], sizes = [4, 1, 4], strides = [1, 1, 1]} : vector<4x4x4xf32> to vector<4x1x4xf32>
    %45 = vector.shape_cast %44 : vector<4x1x4xf32> to vector<4x4xf32>
    %46 = vector.extract_strided_slice %39 {offsets = [0, 3, 0], sizes = [4, 1, 4], strides = [1, 1, 1]} : vector<4x4x4xf32> to vector<4x1x4xf32>
    %47 = vector.shape_cast %46 : vector<4x1x4xf32> to vector<4x4xf32>
    %48 = tpu.concatenate %5, %7, %9, %11, %17, %19, %21, %23, %29, %31, %33, %35, %41, %43, %45, %47 in 1 : vector<4x4xf32>, vector<4x4xf32>, vector<4x4xf32>, vector<4x4xf32>, vector<4x4xf32>, vector<4x4xf32>, vector<4x4xf32>, vector<4x4xf32>, vector<4x4xf32>, vector<4x4xf32>, vector<4x4xf32>, vector<4x4xf32>, vector<4x4xf32>, vector<4x4xf32>, vector<4x4xf32>, vector<4x4xf32> -> vector<4x64xf32>
    %c0_12 = arith.constant 0 : index
    %c0_13 = arith.constant 0 : index
    %c4 = arith.constant 4 : index
    %c0_14 = arith.constant 0 : index
    %49 = vector.load %arg2[%c0_12, %c0_13, %c4, %c0_14] : memref<1x4x8x16xf32, #tpu.memory_space<vmem>>, vector<1x4x1x16xf32>
    %50 = vector.shape_cast %49 : vector<1x4x1x16xf32> to vector<4x16xf32>
    %51 = tpu.transpose %50, [1, 0] : vector<4x16xf32> -> vector<16x4xf32>
    %52 = vector.shape_cast %51 : vector<16x4xf32> to vector<4x4x4xf32>
    %53 = vector.extract_strided_slice %52 {offsets = [0, 0, 0], sizes = [4, 1, 4], strides = [1, 1, 1]} : vector<4x4x4xf32> to vector<4x1x4xf32>
    %54 = vector.shape_cast %53 : vector<4x1x4xf32> to vector<4x4xf32>
    %55 = vector.extract_strided_slice %52 {offsets = [0, 1, 0], sizes = [4, 1, 4], strides = [1, 1, 1]} : vector<4x4x4xf32> to vector<4x1x4xf32>
    %56 = vector.shape_cast %55 : vector<4x1x4xf32> to vector<4x4xf32>
    %57 = vector.extract_strided_slice %52 {offsets = [0, 2, 0], sizes = [4, 1, 4], strides = [1, 1, 1]} : vector<4x4x4xf32> to vector<4x1x4xf32>
    %58 = vector.shape_cast %57 : vector<4x1x4xf32> to vector<4x4xf32>
    %59 = vector.extract_strided_slice %52 {offsets = [0, 3, 0], sizes = [4, 1, 4], strides = [1, 1, 1]} : vector<4x4x4xf32> to vector<4x1x4xf32>
    %60 = vector.shape_cast %59 : vector<4x1x4xf32> to vector<4x4xf32>
    %c0_15 = arith.constant 0 : index
    %c0_16 = arith.constant 0 : index
    %c5 = arith.constant 5 : index
    %c0_17 = arith.constant 0 : index
    %61 = vector.load %arg2[%c0_15, %c0_16, %c5, %c0_17] : memref<1x4x8x16xf32, #tpu.memory_space<vmem>>, vector<1x4x1x16xf32>
    %62 = vector.shape_cast %61 : vector<1x4x1x16xf32> to vector<4x16xf32>
    %63 = tpu.transpose %62, [1, 0] : vector<4x16xf32> -> vector<16x4xf32>
    %64 = vector.shape_cast %63 : vector<16x4xf32> to vector<4x4x4xf32>
    %65 = vector.extract_strided_slice %64 {offsets = [0, 0, 0], sizes = [4, 1, 4], strides = [1, 1, 1]} : vector<4x4x4xf32> to vector<4x1x4xf32>
    %66 = vector.shape_cast %65 : vector<4x1x4xf32> to vector<4x4xf32>
    %67 = vector.extract_strided_slice %64 {offsets = [0, 1, 0], sizes = [4, 1, 4], strides = [1, 1, 1]} : vector<4x4x4xf32> to vector<4x1x4xf32>
    %68 = vector.shape_cast %67 : vector<4x1x4xf32> to vector<4x4xf32>
    %69 = vector.extract_strided_slice %64 {offsets = [0, 2, 0], sizes = [4, 1, 4], strides = [1, 1, 1]} : vector<4x4x4xf32> to vector<4x1x4xf32>
    %70 = vector.shape_cast %69 : vector<4x1x4xf32> to vector<4x4xf32>
    %71 = vector.extract_strided_slice %64 {offsets = [0, 3, 0], sizes = [4, 1, 4], strides = [1, 1, 1]} : vector<4x4x4xf32> to vector<4x1x4xf32>
    %72 = vector.shape_cast %71 : vector<4x1x4xf32> to vector<4x4xf32>
    %c0_18 = arith.constant 0 : index
    %c0_19 = arith.constant 0 : index
    %c6 = arith.constant 6 : index
    %c0_20 = arith.constant 0 : index
    %73 = vector.load %arg2[%c0_18, %c0_19, %c6, %c0_20] : memref<1x4x8x16xf32, #tpu.memory_space<vmem>>, vector<1x4x1x16xf32>
    %74 = vector.shape_cast %73 : vector<1x4x1x16xf32> to vector<4x16xf32>
    %75 = tpu.transpose %74, [1, 0] : vector<4x16xf32> -> vector<16x4xf32>
    %76 = vector.shape_cast %75 : vector<16x4xf32> to vector<4x4x4xf32>
    %77 = vector.extract_strided_slice %76 {offsets = [0, 0, 0], sizes = [4, 1, 4], strides = [1, 1, 1]} : vector<4x4x4xf32> to vector<4x1x4xf32>
    %78 = vector.shape_cast %77 : vector<4x1x4xf32> to vector<4x4xf32>
    %79 = vector.extract_strided_slice %76 {offsets = [0, 1, 0], sizes = [4, 1, 4], strides = [1, 1, 1]} : vector<4x4x4xf32> to vector<4x1x4xf32>
    %80 = vector.shape_cast %79 : vector<4x1x4xf32> to vector<4x4xf32>
    %81 = vector.extract_strided_slice %76 {offsets = [0, 2, 0], sizes = [4, 1, 4], strides = [1, 1, 1]} : vector<4x4x4xf32> to vector<4x1x4xf32>
    %82 = vector.shape_cast %81 : vector<4x1x4xf32> to vector<4x4xf32>
    %83 = vector.extract_strided_slice %76 {offsets = [0, 3, 0], sizes = [4, 1, 4], strides = [1, 1, 1]} : vector<4x4x4xf32> to vector<4x1x4xf32>
    %84 = vector.shape_cast %83 : vector<4x1x4xf32> to vector<4x4xf32>
    %c0_21 = arith.constant 0 : index
    %c0_22 = arith.constant 0 : index
    %c7 = arith.constant 7 : index
    %c0_23 = arith.constant 0 : index
    %85 = vector.load %arg2[%c0_21, %c0_22, %c7, %c0_23] : memref<1x4x8x16xf32, #tpu.memory_space<vmem>>, vector<1x4x1x16xf32>
    %86 = vector.shape_cast %85 : vector<1x4x1x16xf32> to vector<4x16xf32>
    %87 = tpu.transpose %86, [1, 0] : vector<4x16xf32> -> vector<16x4xf32>
    %88 = vector.shape_cast %87 : vector<16x4xf32> to vector<4x4x4xf32>
    %89 = vector.extract_strided_slice %88 {offsets = [0, 0, 0], sizes = [4, 1, 4], strides = [1, 1, 1]} : vector<4x4x4xf32> to vector<4x1x4xf32>
    %90 = vector.shape_cast %89 : vector<4x1x4xf32> to vector<4x4xf32>
    %91 = vector.extract_strided_slice %88 {offsets = [0, 1, 0], sizes = [4, 1, 4], strides = [1, 1, 1]} : vector<4x4x4xf32> to vector<4x1x4xf32>
    %92 = vector.shape_cast %91 : vector<4x1x4xf32> to vector<4x4xf32>
    %93 = vector.extract_strided_slice %88 {offsets = [0, 2, 0], sizes = [4, 1, 4], strides = [1, 1, 1]} : vector<4x4x4xf32> to vector<4x1x4xf32>
    %94 = vector.shape_cast %93 : vector<4x1x4xf32> to vector<4x4xf32>
    %95 = vector.extract_strided_slice %88 {offsets = [0, 3, 0], sizes = [4, 1, 4], strides = [1, 1, 1]} : vector<4x4x4xf32> to vector<4x1x4xf32>
    %96 = vector.shape_cast %95 : vector<4x1x4xf32> to vector<4x4xf32>
    %97 = tpu.concatenate %54, %56, %58, %60, %66, %68, %70, %72, %78, %80, %82, %84, %90, %92, %94, %96 in 1 : vector<4x4xf32>, vector<4x4xf32>, vector<4x4xf32>, vector<4x4xf32>, vector<4x4xf32>, vector<4x4xf32>, vector<4x4xf32>, vector<4x4xf32>, vector<4x4xf32>, vector<4x4xf32>, vector<4x4xf32>, vector<4x4xf32>, vector<4x4xf32>, vector<4x4xf32>, vector<4x4xf32>, vector<4x4xf32> -> vector<4x64xf32>
    %98 = tpu.concatenate %48, %97 in 0 : vector<4x64xf32>, vector<4x64xf32> -> vector<8x64xf32>
    %c0_24 = arith.constant 0 : index
    %c0_25 = arith.constant 0 : index
    %c0_26 = arith.constant 0 : index
    %99 = vector.load %arg3[%c0_24, %c0_25, %c0_26] : memref<1x8x64xf32, #tpu.memory_space<vmem>>, vector<1x8x64xf32>
    %100 = vector.shape_cast %99 : vector<1x8x64xf32> to vector<8x64xf32>
    %101 = vector.shape_cast %98 : vector<8x64xf32> to vector<1x8x64xf32>
    tpu.vector_store %arg3[%c0_24, %c0_25, %c0_26], %101 {strides = array<i32>} : memref<1x8x64xf32, #tpu.memory_space<vmem>>, vector<1x8x64xf32>,
    return
  }
  func.func @transform_0(%arg0: i32, %arg1: i32) -> (i32, i32, i32, i32) {
    %c0_i32 = arith.constant 0 : i32
    %c0_i32_0 = arith.constant 0 : i32
    %c0_i32_1 = arith.constant 0 : i32
    return %arg0, %c0_i32, %arg1, %c0_i32_0 : i32, i32, i32, i32
  }
  func.func @transform_1(%arg0: i32, %arg1: i32) -> (i32, i32, i32) {
    %c0_i32 = arith.constant 0 : i32
    %c0_i32_0 = arith.constant 0 : i32
    return %arg0, %arg1, %c0_i32 : i32, i32, i32
  }
}

</mosaic_0001>

<bundles_post_ra>
// kernel: tpu_custom_call.1
= control target key start
LH: loop header
LB: loop body
LE: loop exit
PB: predicated region body
PF: predicated region fallthrough
CT: control target
= control target key end

     0   :  { %6 = vsyncpa [#allocation3], 0  ;;  %s2501_s0 = inlined_call_operand.hbm [shape: f32[2,4,16,16], index: 0, kind: input, shape index: {}]   ;;  %s2502_s1 = inlined_call_operand.hbm [shape: f32[2,16,64], index: 1, kind: output, shape index: {}]  }
   0x1   :  { %8 = vsyncpa [#allocation3 + $0x1], 0 }
   0x2   :  { %9 = vsyncpa [#allocation4], 0 }
   0x3   :  { %11 = vsyncpa [#allocation4 + $0x1], 0  ;;  %s1688_s6 = smov 0   ;;  %s1690_s7 = smov 0  }
   0x4   :  { %s1692_s8 = smov 0   ;;  %s1694_s9 = smov 0  }
   0x5   :  { %s1696_s10 = smov 0   ;;  %s1698_s11 = smov 0  }
   0x6   :  { %s1700_s12 = smov 0   ;;  %s1702_s13 = smov 0  }
   0x7 LB: > { %s1416_s14 = sadd.s32 4294967295, %s1656_s13   ;;  %s1417_s15 = sadd.s32 4294967294, %s1656_s13   ;;  %s1656_s13 = sphi %s1702_s13, %s17_s13   ;;  %s1652_s12 = sphi %s1700_s12, %s2518_s12   ;;  %s1648_s11 = sphi %s1698_s11, %s2517_s11   ;;  %s1644_s10 = sphi %s1696_s10, %s2516_s10   ;;  %s1640_s9 = sphi %s1694_s9, %s2515_s9   ;;  %s1636_s8 = sphi %s1692_s8, %s2514_s8   ;;  %s1632_s7 = sphi %s1690_s7, %s2513_s7   ;;  %s1628_s6 = sphi %s1688_s6, %s2512_s6  }
   0x8   : > { %s26_s16 = sadd.s32 1, %s1648_s11  ;;  %s29_s17 = sadd.s32 1, %s1652_s12 }
   0x9   : > { %p27_p0 = scmp.ge.s32.totalorder %s26_s16, 2  ;;  %s38_s18 = sadd.s32 1, %s1636_s8 }
   0xa   : > { %p45_p1 = scmp.ne.s32.totalorder %s1636_s8, %s1632_s7  ;;  %p46_p2 = scmp.eq.s32.totalorder %s1656_s13, 0 }
   0xb   : > { %s2520_s16 = smov (%p27_p0, %s26_s16), 0  ;;  %s2522_s17 = smov (!%p27_p0, %s29_s17), %s1652_s12 }
   0xc   : > { %s34_s19 = ssub.s32 %s1648_s11, %s2520_s16  ;;  %p1741_p3 = por %p46_p2, %p45_p1 }
   0xd   : > { %p31_p4 = scmp.ge.s32.totalorder %s2522_s17, 2  ;;  %p51_p5 = scmp.ne.s32.totalorder %s1632_s7, %s1628_s6 }
   0xe   : > { %p52_p6 = scmp.eq.s32.totalorder %s1416_s14, 0  ;;  %p77_p7 = scmp.eq.s32.totalorder %s1416_s14, 3 }
   0xf   : > { %s2524_s17 = smov (%p31_p4, %s2522_s17), 0  ;;  %p83_p10 = scmp.eq.s32.totalorder %s1417_s15, 3 }
  0x10   : > { %p1749_p8 = por %p52_p6, %p51_p5  ;;  %p1753_p9 = por %p77_p7, %p45_p1 }
  0x11   : > { %s33_s23 = ssub.s32 %s1652_s12, %s2524_s17  ;;  %p1759_p12 = por %p83_p10, %p51_p5 }
  0x12   : > { %s2506_s22 = scalar_select %p1753_p9, 1, 0 }
  0x13   : > { %s35_s24 = sor.u32 %s34_s19, %s33_s23  ;;  %p1443_p13 = scmp.lt.s32.totalorder %s1656_s13, 4 }
  0x14   : > { %p36_p11 = scmp.eq.s32.totalorder %s35_s24, 0  ;;  %s103_s26 = sand.u32 1, %s1636_s8  }
  0x15   : > { %s2507_s25 = scalar_select %p1759_p12, 1, 0 }
  0x16   : > { %s1766_s27 = scalar_select %p36_p11, %s1636_s8, %s38_s18  }
  0x17   : > { %s1420_s28 = sshll.u32 %s103_s26, 5  ;;  %s1421_s29 = sshll.u32 %s1652_s12, 3 }
  0x18   : > { %s112_s30 = sadd.s32 %s1648_s11, %s1421_s29  ;;  %s107_s2 = scalar_lea.vmem [#allocation2], %s1420_s28 }
  0x19   : > { %s115_s3 = sshll.u32 %s107_s2, 4  ;;  %s1422_s4 = sshll.u32 %s112_s30, 7  ;;  %s1770_s3 = int_to_ptr.vmem [resolvable:$true] %s115_s3 }
  0x1a   : > { %s1775_s15 = scalar_lea.hbm %s2501_s0, %s1422_s4  ;;  %p1779_p0 = pnand %p1443_p13, %p1741_p3 }
  0x1b   : > { %s1783_s19 = scalar_lea.sflag [#allocation3], %s103_s26  ;;  %s1528_s23 = scalar_lea.hbm %s1775_s15, 512 }
  0x1c   : > { %p1529_p1 = scmp.ne.s32.totalorder %s1775_s15, %s1528_s23  ;;  %p1530_p2 = pneg %p1779_p0 }
  0x1d   : > { %s1533_s28 = scalar_lea.hbm %s2501_s0, 2048  ;;  %p1534_p3 = scmp.lt.u32.totalorder %s1775_s15, %s2501_s0 }
  0x1e   : > { %p1531_p4 = pnand %p1530_p2, %p1529_p1  ;;  %p1535_p6 = scmp.lt.u32.totalorder %s1533_s28, %s1528_s23 }
  0x1f   : > { %p1537_p10 = scmp.lt.u32.totalorder %s1528_s23, %s1775_s15 }
  0x20   : > { %p1532_p5 = pneg %p1531_p4  ;;  %p1536_p7 = por %p1535_p6, %p1534_p3 }
  0x22   : > { %p1538_p11 = por %p1537_p10, %p1536_p7 }
  0x24   : > { %p1539_p13 = pnand %p1538_p11, %p1532_p5 }
  0x26   : > { %1542 = shalt.err (!%p1539_p13)
}
  0x27   : > { %s1543_s26 = scalar_lea.vmem %s1770_s3, 512  ;;  %s1658_s2 = smov [#allocation2]  }
  0x28   : > { %p1544_p1 = scmp.ne.s32.totalorder %s1770_s3, %s1543_s26  ;;  %s1548_s4 = sshll.u32 %s1658_s2, 4  ;;  %s1549_s4 = int_to_ptr.vmem [resolvable:$false] %s1548_s4 }
  0x29   : > { %s1550_s5 = scalar_lea.vmem %s1549_s4, 1024  ;;  %p1551_p9 = scmp.lt.s32.totalorder %s1770_s3, %s1549_s4 }
  0x2a   : > { %p1546_p4 = pnand %p1544_p1, %p1530_p2  ;;  %p1552_p3 = scmp.lt.s32.totalorder %s1550_s5, %s1543_s26 }
  0x2c   : > { %p1547_p12 = pneg %p1546_p4  ;;  %p1553_p6 = por %p1552_p3, %p1551_p9 }
  0x2e   : > { %p1554_p7 = pnand %p1553_p6, %p1547_p12 }
  0x30   : > { %1557 = shalt.err (!%p1554_p7)
}
  0x31   : > { %s1659_s14 = smov 256   ;;  %s1660_s23 = smov 128  }
  0x32   : > { %s1661_s20 = smov 8   ;;  %p1423_p2 = scmp.ge.s32.totalorder %s1656_s13, 1 }
  0x33   : > { %1438 = dma.hbm_to_vmem [thread:$0]  (!%p1779_p0), %s1775_s15, 512, %s1770_s3, %s1783_s19, %s1659_s14, %s1660_s23, %s1661_s20  }
  0x34   : > { %p123_p5 = scmp.lt.s32.totalorder %s1656_s13, 5 }
  0x36   : > { %p124_p10 = pnand %p1423_p2, %p123_p5 }
  0x37   : > { %s1814_s24 = sand.u32 (!%p124_p10), 1, %s1632_s7  }
  0x38   : > { %127 = sbr.rel (%p124_p10) target bundleno = 413 (0x19d), region = 24  ;;  %s1424_s28 = sshll.u32 (!%p124_p10), %s1814_s24, 5 }
  0x39   : > { %s130_s29 = scalar_lea.sflag (!%p124_p10), [#allocation3], %s1814_s24  ;;  %s1818_s30 = scalar_lea.vmem (!%p124_p10), [#allocation2], %s1424_s28 }
  0x3f   : > { %1619 = dma.done.wait (%p1749_p8), %s130_s29, 512  }
  0x40   : > { %1621 = vsyncadd (%p1749_p8), %s130_s29, 4294966784  ;;  %vm161_vm0 = vcmask 1041409   ;;  %vm164_vm1 = vcmask 1042434   ;;  %v257_v0 = vld [vmem:[%s1818_s30 + $0x2] sm:$0x1]  ;;  %vm167_vm2 = vcmask 1043459  }
  0x41   : > { %v258_v1 = vld [vmem:[%s1818_s30 + $0xa] sm:$0x1]  ;;  %v259_v2 = vld [vmem:[%s1818_s30 + $0x12] sm:$0x1]  ;;  %v260_v3 = vld [vmem:[%s1818_s30 + $0x1a] sm:$0x1] }
  0x42   : > { %v265_v4 = vrot.slane %v258_v1, 7  ;;  %v267_v5 = vrot.slane %v259_v2, 6  ;;  %v152_v6 = vld [vmem:[%s1818_s30] sm:$0x1]  ;;  %v269_v7 = vrot.slane %v260_v3, 5  ;;  %s1662_s21 = smov 4  }
  0x43   : > { %v153_v8 = vld [vmem:[%s1818_s30 + $0x8] sm:$0x1]  ;;  %v154_v9 = vld [vmem:[%s1818_s30 + $0x10] sm:$0x1]  ;;  %v155_v11 = vld [vmem:[%s1818_s30 + $0x18] sm:$0x1] }
  0x44   : > { %v266_v10 = vsel %vm161_vm0, %v265_v4, %v257_v0  ;;  %v160_v12 = vrot.slane %v153_v8, 7  ;;  %v163_v13 = vrot.slane %v154_v9, 6  ;;  %v308_v14 = vld [vmem:[%s1818_s30 + $0x3] sm:$0x1]  ;;  %v166_v16 = vrot.slane %v155_v11, 5  ;;  %s1663_s3 = smov 8  }
  0x45   : > { %v268_v15 = vsel %vm164_vm1, %v267_v5, %v266_v10  ;;  %v309_v17 = vld [vmem:[%s1818_s30 + $0xb] sm:$0x1]  ;;  %v310_v18 = vld [vmem:[%s1818_s30 + $0x13] sm:$0x1]  ;;  %v311_v21 = vld [vmem:[%s1818_s30 + $0x1b] sm:$0x1] }
  0x46   : > { %v270_v19 = vsel %vm167_vm2, %v269_v7, %v268_v15  ;;  %v162_v20 = vsel %vm161_vm0, %v160_v12, %v152_v6  ;;  %v316_v22 = vrot.slane %v309_v17, 7  ;;  %v318_v23 = vrot.slane %v310_v18, 6  ;;  %v739_v24 = vld [vmem:[%s1818_s30 + $0x4] sm:$0x1]  ;;  %v740_v27 = vld [vmem:[%s1818_s30 + $0xc] sm:$0x1] }
  0x47   : > { %272 = vxpose.xlu1.b32.start.end [1/1] (short) (narrow) %v270_v19, 16  ;;  %v165_v25 = vsel %vm164_vm1, %v163_v13, %v162_v20  ;;  %v320_v26 = vrot.slane %v311_v21, 5  ;;  %v741_v28 = vld [vmem:[%s1818_s30 + $0x14] sm:$0x1]  ;;  %v742_v31 = vld [vmem:[%s1818_s30 + $0x1c] sm:$0x1] }
  0x48   : > { %v168_v29 = vsel %vm167_vm2, %v166_v16, %v165_v25  ;;  %v317_v30 = vsel %vm161_vm0, %v316_v22, %v308_v14  ;;  %v747_v32 = vrot.slane %v740_v27, 7  ;;  %v749_v33 = vrot.slane %v741_v28, 6  ;;  %v791_v35 = vld [vmem:[%s1818_s30 + $0xd] sm:$0x1]  ;;  %v792_v36 = vld [vmem:[%s1818_s30 + $0x15] sm:$0x1] }
  0x49   : > { %170 = vxpose.xlu0.b32.start.end [1/1] (short) (narrow) %v168_v29, 16  ;;  %v319_v34 = vsel %vm164_vm1, %v318_v23, %v317_v30  ;;  %v751_v39 = vrot.slane %v742_v31, 5  ;;  %v790_v40 = vld [vmem:[%s1818_s30 + $0x5] sm:$0x1]  ;;  %v793_v41 = vld [vmem:[%s1818_s30 + $0x1d] sm:$0x1]  ;;  %v359_v16 = vlaneseq }
  0x4a   : > { %v321_v37 = vsel %vm167_vm2, %v320_v26, %v319_v34  ;;  %v748_v38 = vsel %vm161_vm0, %v747_v32, %v739_v24  ;;  %v798_v42 = vrot.slane %v791_v35, 7  ;;  %v206_v44 = vld [vmem:[%s1818_s30 + $0x1] sm:$0x1]  ;;  %v207_v45 = vld [vmem:[%s1818_s30 + $0x9] sm:$0x1]  ;;  %v800_v47 = vrot.slane %v792_v36, 6 }
  0x4b   : > { %v750_v43 = vsel %vm164_vm1, %v749_v33, %v748_v38  ;;  %v208_v46 = vld [vmem:[%s1818_s30 + $0x11] sm:$0x1]  ;;  %v209_v48 = vld [vmem:[%s1818_s30 + $0x19] sm:$0x1]  ;;  %v214_v49 = vrot.slane %v207_v45, 7  ;;  %v802_v58 = vrot.slane %v793_v41, 5 }
  0x4c   : > { %323 = vxpose.xlu1.b32.start.end [1/1] (short) (narrow) %v321_v37, 16  ;;  %v216_v50 = vrot.slane %v208_v46, 6  ;;  %v799_v51 = vsel %vm161_vm0, %v798_v42, %v790_v40  ;;  %v218_v52 = vrot.slane %v209_v48, 5  ;;  %v842_v53 = vld [vmem:[%s1818_s30 + $0xe] sm:$0x1]  ;;  %v752_v54 = vsel %vm167_vm2, %v751_v39, %v750_v43  ;;  %s1664_s15 = smov 16  }
  0x4d   : > { %v215_v55 = vsel %vm161_vm0, %v214_v49, %v206_v44  ;;  %v843_v56 = vld [vmem:[%s1818_s30 + $0x16] sm:$0x1]  ;;  %v849_v57 = vrot.slane %v842_v53, 7  ;;  %v841_v60 = vld [vmem:[%s1818_s30 + $0x6] sm:$0x1]  ;;  %v801_v61 = vsel %vm164_vm1, %v800_v47, %v799_v51  ;;  %v360_v17 = vshrl.u32 %v359_v16, 7 }
  0x4e   : > { %v217_v59 = vsel %vm164_vm1, %v216_v50, %v215_v55  ;;  %v893_v63 = vld [vmem:[%s1818_s30 + $0xf] sm:$0x1]  ;;  %v844_v0 = vld [vmem:[%s1818_s30 + $0x1e] sm:$0x1]  ;;  %v851_v1 = vrot.slane %v843_v56, 6  ;;  %v803_v3 = vsel %vm167_vm2, %v802_v58, %v801_v61  ;;  %s1665_s18 = smov 12  }
  0x4f   : > { %v219_v62 = vsel %vm167_vm2, %v218_v52, %v217_v59  ;;  %v850_v2 = vsel %vm161_vm0, %v849_v57, %v841_v60  ;;  %v894_v4 = vld [vmem:[%s1818_s30 + $0x17] sm:$0x1]  ;;  %v900_v5 = vrot.slane %v893_v63, 7  ;;  %v853_v6 = vrot.slane %v844_v0, 5  ;;  %v892_v7 = vld [vmem:[%s1818_s30 + $0x7] sm:$0x1] }
  0x50   : > { %221 = vxpose.xlu0.b32.start.end [1/1] (short) (narrow) %v219_v62, 16  ;;  %v852_v8 = vsel %vm164_vm1, %v851_v1, %v850_v2  ;;  %v895_v9 = vld [vmem:[%s1818_s30 + $0x1f] sm:$0x1]  ;;  %v902_v10 = vrot.slane %v894_v4, 6  ;;  %v1882_v19 = vsub.s32 0, %v360_v17  ;;  %v1884_v20 = vsub.s32 1, %v360_v17 }
  0x51   : > { %754 = vxpose.xlu1.b32.start.end [1/1] (short) (narrow) %v752_v54, 16  ;;  %v901_v11 = vsel %vm161_vm0, %v900_v5, %v892_v7  ;;  %v854_v12 = vsel %vm167_vm2, %v853_v6, %v852_v8  ;;  %v904_v13 = vrot.slane %v895_v9, 5  ;;  %v1886_v21 = vsub.s32 2, %v360_v17  ;;  %s1666_s19 = smov 20   ;;  %s1667_s26 = smov 24  }
  0x52   : > { %v903_v14 = vsel %vm164_vm1, %v902_v10, %v901_v11  ;;  %v1942_v48 = vsub.s32 3, %v360_v17  ;;  %s1668_s2 = smov 28   ;;  %s1669_s4 = smov 32   ;;  %vm709_vm3 = vcmask 31744   ;;  %vm713_vm4 = vcmask 97280  }
  0x53   : > { %v905_v15 = vsel %vm167_vm2, %v904_v13, %v903_v14  ;;  %s1670_s5 = smov 36   ;;  %s1671_s14 = smov 40   ;;  %vm711_vm5 = vcmask 64512   ;;  %vm715_vm6 = vcmask 130048   ;;  %vm717_vm7 = vcmask 162816  }
  0x54   : > { %s1672_s23 = smov 44   ;;  %s1673_s20 = smov 48   ;;  %vm719_vm8 = vcmask 195584   ;;  %vm721_vm9 = vcmask 228352   ;;  %vm723_vm10 = vcmask 261120   ;;  %vm725_vm11 = vcmask 293888  }
  0x55   : > { %s1674_s28 = smov 52   ;;  %s1675_s29 = smov 56   ;;  %vm727_vm12 = vcmask 326656   ;;  %vm729_vm13 = vcmask 359424   ;;  %vm731_vm14 = vcmask 392192   ;;  %vm733_vm15 = vcmask 424960  }
  0x56   : > { %805 = vxpose.xlu1.b32.start.end [1/1] (short) (narrow) %v803_v3, 16  ;;  %s1676_s30 = smov 60   ;;  %p2510_p9 = scmp.ne.s32.totalorder %s2506_s22, 0 }
  0x5b   : > { %856 = vxpose.xlu1.b32.start.end [1/1] (short) (narrow) %v854_v12, 16 }
  0x60   : > { %907 = vxpose.xlu1.b32.start.end [1/1] (short) (narrow) %v905_v15, 16 }
  0xc7   : > { %v1880_v18 = vpop.trf.xlu1 }
  0xc8   : > { %v1934_v44 = vcombine.high %v1880_v18, %v1880_v18  ;;  %v536_v51 = vrot.slane %v1880_v18, %v1882_v19  ;;  %v558_v52 = vrot.slane %v1880_v18, %v1884_v20  ;;  %v580_v55 = vrot.slane %v1880_v18, %v1886_v21 }
  0xc9   : > { %v1888_v22 = vpop.trf.xlu0 }
  0xca   : > { %v1892_v23 = vcombine.high %v1888_v22, %v1888_v22  ;;  %v362_v24 = vrot.slane %v1888_v22, %v1882_v19  ;;  %v382_v25 = vrot.slane %v1888_v22, %v1884_v20  ;;  %v404_v26 = vrot.slane %v1888_v22, %v1886_v21 }
  0xcb   : > { %v1900_v27 = vpop.trf.xlu1  ;;  %v540_v50 = vrot.slane %v1934_v44, %v1882_v19  ;;  %v426_v57 = vrot.slane %v1888_v22, %v1942_v48  ;;  %v562_v58 = vrot.slane %v1934_v44, %v1884_v20  ;;  %v584_v62 = vrot.slane %v1934_v44, %v1886_v21 }
  0xcc   : > { %v386_v28 = vrot.slane %v1892_v23, %v1884_v20  ;;  %v408_v29 = vrot.slane %v1892_v23, %v1886_v21  ;;  %v1968_v59 = vcombine.high %v1900_v27, %v1900_v27  ;;  %v430_v1 = vrot.slane %v1892_v23, %v1942_v48 }
  0xcd   : > { %v1906_v30 = vpop.trf.xlu0  ;;  %v544_v2 = vrot.slane %v1900_v27, %v1882_v19  ;;  %v1985_v3 = vsel %vm161_vm0, %v540_v50, %v536_v51  ;;  %v566_v10 = vrot.slane %v1900_v27, %v1884_v20  ;;  %v2003_v11 = vsel %vm161_vm0, %v562_v58, %v558_v52 }
  0xce   : > { %v1910_v31 = vcombine.high %v1906_v30, %v1906_v30  ;;  %v370_v32 = vrot.slane %v1906_v30, %v1882_v19  ;;  %v390_v33 = vrot.slane %v1906_v30, %v1884_v20  ;;  %v395_v34 = vsel %vm161_vm0, %v386_v28, %v382_v25 }
  0xcf   : > { %v1917_v35 = vpop.trf.xlu1  ;;  %v412_v36 = vrot.slane %v1906_v30, %v1886_v21  ;;  %v417_v37 = vsel %vm161_vm0, %v408_v29, %v404_v26  ;;  %v434_v16 = vrot.slane %v1906_v30, %v1942_v48  ;;  %v439_v29 = vsel %vm161_vm0, %v430_v1, %v426_v57 }
  0xd0   : > { %v646_v38 = vrot.slane %v1917_v35, %v1884_v20  ;;  %v668_v39 = vrot.slane %v1917_v35, %v1886_v21  ;;  %v394_v40 = vrot.slane %v1910_v31, %v1884_v20  ;;  %v396_v41 = vsel %vm164_vm1, %v390_v33, %v395_v34 }
  0xd1   : > { %v416_v42 = vrot.slane %v1910_v31, %v1886_v21  ;;  %v418_v43 = vsel %vm164_vm1, %v412_v36, %v417_v37  ;;  %v2008_v14 = vpop.trf.xlu0  ;;  %v2026_v33 = vcombine.high %v1917_v35, %v1917_v35  ;;  %v690_v34 = vrot.slane %v1917_v35, %v1942_v48 }
  0xd2   : > { %v397_v45 = vsel %vm167_vm2, %v394_v40, %v396_v41  ;;  %v2020_v26 = vcombine.high %v2008_v14, %v2008_v14  ;;  %v448_v57 = vrot.slane %v2008_v14, %v1882_v19  ;;  %v470_v58 = vrot.slane %v2008_v14, %v1884_v20 }
  0xd3   : > { %v419_v46 = vsel %vm167_vm2, %v416_v42, %v418_v43  ;;  %v1938_v47 = vpop.trf.xlu1  ;;  %398 = vrot.lane.b32.xlu0 %v397_v45, %s1662_s21 }
  0xd4   : > { %420 = vrot.lane.b32.xlu1 %v419_v46, %s1663_s3 }
  0xd5   : > { %v2064_v1 = vpop.trf.xlu0 }
  0xd7   : > { %v1944_v49 = vpop.trf.xlu1 }
  0xd8   : > { %v1954_v53 = vcombine.high %v1944_v49, %v1944_v49  ;;  %v946_v54 = vrot.slane %v1944_v49, %v1882_v19  ;;  %v966_v60 = vrot.slane %v1944_v49, %v1884_v20  ;;  %v988_v8 = vrot.slane %v1944_v49, %v1886_v21 }
  0xd9   : > { %v1010_v17 = vrot.slane %v1944_v49, %v1942_v48  ;;  %v610_v49 = vrot.slane %v1900_v27, %v1942_v48 }
  0xda   : > { %v970_v61 = vrot.slane %v1954_v53, %v1884_v20  ;;  %v992_v0 = vrot.slane %v1954_v53, %v1886_v21  ;;  %v1014_v9 = vrot.slane %v1954_v53, %v1942_v48 }
  0xdb   : > { %v1976_v63 = vpop.trf.xlu1 }
  0xdc   : > { %v1989_v4 = vcombine.high %v1976_v63, %v1976_v63  ;;  %v954_v5 = vrot.slane %v1976_v63, %v1882_v19  ;;  %v974_v6 = vrot.slane %v1976_v63, %v1884_v20  ;;  %v979_v7 = vsel %vm161_vm0, %v970_v61, %v966_v60 }
  0xdd   : > { %v996_v15 = vrot.slane %v1976_v63, %v1886_v21  ;;  %v1001_v28 = vsel %vm161_vm0, %v992_v0, %v988_v8  ;;  %v1018_v42 = vrot.slane %v1976_v63, %v1942_v48  ;;  %v1023_v43 = vsel %vm161_vm0, %v1014_v9, %v1010_v17 }
  0xde   : > { %v978_v12 = vrot.slane %v1989_v4, %v1884_v20  ;;  %v980_v13 = vsel %vm164_vm1, %v974_v6, %v979_v7  ;;  %v1000_v41 = vrot.slane %v1989_v4, %v1886_v21  ;;  %v452_v60 = vrot.slane %v2020_v26, %v1882_v19 }
  0xdf   : > { %v2016_v25 = vpop.trf.xlu1  ;;  %v1002_v46 = vsel %vm164_vm1, %v996_v15, %v1001_v28  ;;  %v474_v61 = vrot.slane %v2020_v26, %v1884_v20  ;;  %v1022_v8 = vrot.slane %v1989_v4, %v1942_v48 }
  0xe0   : > { %v2032_v36 = vcombine.high %v2016_v25, %v2016_v25  ;;  %v1032_v37 = vrot.slane %v2016_v25, %v1882_v19  ;;  %v981_v40 = vsel %vm167_vm2, %v978_v12, %v980_v13  ;;  %v1054_v45 = vrot.slane %v2016_v25, %v1884_v20 }
  0xe1   : > { %982 = vrot.lane.b32.xlu0 %v981_v40, %s1662_s21  ;;  %v1076_v9 = vrot.slane %v2016_v25, %v1886_v21  ;;  %v1003_v12 = vsel %vm167_vm2, %v1000_v41, %v1002_v46  ;;  %v1024_v13 = vsel %vm164_vm1, %v1018_v42, %v1023_v43  ;;  %v2086_v41 = vcombine.high %v2064_v1, %v2064_v1  ;;  %s1425_s21 = sshll.u32 %s1814_s24, 3 }
  0xe2   : > { %v1036_v50 = vrot.slane %v2032_v36, %v1882_v19  ;;  %v1058_v51 = vrot.slane %v2032_v36, %v1884_v20  ;;  %v1080_v40 = vrot.slane %v2032_v36, %v1886_v21  ;;  %v438_v43 = vrot.slane %v1910_v31, %v1942_v48 }
  0xe3   : > { %v2050_v52 = vpop.trf.xlu1  ;;  %v440_v46 = vsel %vm164_vm1, %v434_v16, %v439_v29 }
  0xe4   : > { %v2062_v0 = vcombine.high %v2050_v52, %v2050_v52  ;;  %v1040_v6 = vrot.slane %v2050_v52, %v1882_v19  ;;  %v1045_v7 = vsel %vm161_vm0, %v1036_v50, %v1032_v37  ;;  %v1062_v15 = vrot.slane %v2050_v52, %v1884_v20 }
  0xe5   : > { %1004 = vrot.lane.b32.xlu0 %v1003_v12, %s1663_s3  ;;  %v1067_v37 = vsel %vm161_vm0, %v1058_v51, %v1054_v45  ;;  %v456_v50 = vrot.slane %v2064_v1, %v1882_v19  ;;  %v461_v51 = vsel %vm161_vm0, %v452_v60, %v448_v57  ;;  %v1025_v12 = vsel %vm167_vm2, %v1022_v8, %v1024_v13  ;;  %s1427_s3 = sshll.u32 %s1644_s10, 1 }
  0xe6   : > { %v1044_v17 = vrot.slane %v2062_v0, %v1882_v19  ;;  %v1046_v28 = vsel %vm164_vm1, %v1040_v6, %v1045_v7  ;;  %v1066_v45 = vrot.slane %v2062_v0, %v1884_v20  ;;  %v478_v7 = vrot.slane %v2064_v1, %v1884_v20 }
  0xe7   : > { %v2088_v42 = vpop.trf.xlu1  ;;  %v1068_v16 = vsel %vm164_vm1, %v1062_v15, %v1067_v37  ;;  %v1084_v29 = vrot.slane %v2050_v52, %v1886_v21  ;;  %v1089_v60 = vsel %vm161_vm0, %v1080_v40, %v1076_v9  ;;  %v1102_v8 = vrot.slane %v2032_v36, %v1942_v48 }
  0xe8   : > { %v1047_v6 = vsel %vm167_vm2, %v1044_v17, %v1046_v28  ;;  %v483_v17 = vsel %vm161_vm0, %v474_v61, %v470_v58  ;;  %v1098_v28 = vrot.slane %v2016_v25, %v1942_v48  ;;  %v2111_v57 = vcombine.high %v2088_v42, %v2088_v42 }
  0xe9   : > { %1048 = vrot.lane.b32.xlu1 %v1047_v6, %s1664_s15  ;;  %1026 = vrot.lane.b32.xlu0 %v1025_v12, %s1665_s18  ;;  %v492_v13 = vrot.slane %v2008_v14, %v1886_v21  ;;  %v460_v58 = vrot.slane %v2086_v41, %v1882_v19  ;;  %v482_v25 = vrot.slane %v2086_v41, %v1884_v20 }
  0xea   : > { %v496_v61 = vrot.slane %v2020_v26, %v1886_v21  ;;  %v1069_v15 = vsel %vm167_vm2, %v1066_v45, %v1068_v16  ;;  %v1088_v9 = vrot.slane %v2062_v0, %v1886_v21  ;;  %v462_v37 = vsel %vm164_vm1, %v456_v50, %v461_v51 }
  0xeb   : > { %v484_v36 = vsel %vm164_vm1, %v478_v7, %v483_v17  ;;  %v514_v40 = vrot.slane %v2008_v14, %v1942_v48  ;;  %v441_v6 = vsel %vm167_vm2, %v438_v43, %v440_v46  ;;  %v2133_v12 = vpop.trf.xlu1  ;;  %v1090_v56 = vsel %vm164_vm1, %v1084_v29, %v1089_v60 }
  0xec   : > { %v1106_v45 = vrot.slane %v2050_v52, %v1942_v48  ;;  %v1120_v50 = vrot.slane %v2088_v42, %v1882_v19  ;;  %v1111_v51 = vsel %vm161_vm0, %v1102_v8, %v1098_v28  ;;  %v1124_v14 = vrot.slane %v2111_v57, %v1882_v19 }
  0xed   : > { %1070 = vrot.lane.b32.xlu1 %v1069_v15, %s1666_s19  ;;  %442 = vrot.lane.b32.xlu0 %v441_v6, %s1665_s18  ;;  %v518_v7 = vrot.slane %v2020_v26, %v1942_v48  ;;  %v463_v43 = vsel %vm167_vm2, %v460_v58, %v462_v37  ;;  %v485_v46 = vsel %vm167_vm2, %v482_v25, %v484_v36  ;;  %s151_s18 = scalar_lea.vmem [#allocation5], %s1425_s21 }
  0xee   : > { %v500_v16 = vrot.slane %v2064_v1, %v1886_v21  ;;  %v505_v52 = vsel %vm161_vm0, %v496_v61, %v492_v13  ;;  %v2152_v29 = vcombine.high %v2133_v12, %v2133_v12  ;;  %v1091_v17 = vsel %vm167_vm2, %v1088_v9, %v1090_v56 }
  0xef   : > { %v1110_v28 = vrot.slane %v2062_v0, %v1942_v48  ;;  %v504_v26 = vrot.slane %v2086_v41, %v1886_v21  ;;  %v1142_v60 = vrot.slane %v2088_v42, %v1884_v20  ;;  %v1112_v8 = vsel %vm164_vm1, %v1106_v45, %v1111_v51 }
  0xf0   : > { %v1128_v13 = vrot.slane %v2133_v12, %v1882_v19  ;;  %v1146_v56 = vrot.slane %v2111_v57, %v1884_v20  ;;  %v1164_v0 = vrot.slane %v2088_v42, %v1886_v21  ;;  %v1133_v58 = vsel %vm161_vm0, %v1124_v14, %v1120_v50  ;;  %v2184_v50 = vpop.trf.xlu1 }
  0xf1   : > { %1092 = vrot.lane.b32.xlu1 %v1091_v17, %s1667_s26  ;;  %464 = vrot.lane.b32.xlu0 %v463_v43, %s1664_s15  ;;  %v522_v25 = vrot.slane %v2064_v1, %v1942_v48  ;;  %v1168_v61 = vrot.slane %v2111_v57, %v1886_v21  ;;  %v1186_v15 = vrot.slane %v2088_v42, %v1942_v48  ;;  %s1327_s15 = sadd.s32 %s1640_s9, %s1427_s3 }
  0xf2   : > { %v506_v9 = vsel %vm164_vm1, %v500_v16, %v505_v52  ;;  %v527_v37 = vsel %vm161_vm0, %v518_v7, %v514_v40  ;;  %v1190_v36 = vrot.slane %v2111_v57, %v1942_v48  ;;  %v1113_v6 = vsel %vm167_vm2, %v1110_v28, %v1112_v8  ;;  %s1428_s10 = sshll.u32 %s1327_s15, 7 }
  0xf3   : > { %v1132_v45 = vrot.slane %v2152_v29, %v1882_v19  ;;  %v1150_v1 = vrot.slane %v2133_v12, %v1884_v20  ;;  %v526_v42 = vrot.slane %v2086_v41, %v1942_v48  ;;  %v1134_v40 = vsel %vm164_vm1, %v1128_v13, %v1133_v58 }
  0xf4   : > { %v1155_v57 = vsel %vm161_vm0, %v1146_v56, %v1142_v60  ;;  %v1172_v51 = vrot.slane %v2133_v12, %v1886_v21  ;;  %v548_v14 = vrot.slane %v1968_v59, %v1882_v19  ;;  %v528_v7 = vsel %vm164_vm1, %v522_v25, %v527_v37  ;;  %v2234_v25 = vpop.trf.xlu1 }
  0xf5   : > { %1114 = vrot.lane.b32.xlu1 %v1113_v6, %s1668_s2  ;;  %486 = vrot.lane.b32.xlu0 %v485_v46, %s1666_s19  ;;  %v1177_v43 = vsel %vm161_vm0, %v1168_v61, %v1164_v0  ;;  %v550_v41 = vsel %vm164_vm1, %v544_v2, %v1985_v3  ;;  %v1194_v16 = vrot.slane %v2133_v12, %v1942_v48  ;;  %s1331_s19 = sshll.u32 %s151_s18, 4  ;;  %s2449_s19 = int_to_ptr.vmem [resolvable:$true] %s1331_s19 }
  0xf6   : > { %v2209_v52 = vcombine.high %v1938_v47, %v1938_v47  ;;  %v2213_v46 = vcombine.high %v2184_v50, %v2184_v50  ;;  %v1154_v17 = vrot.slane %v2152_v29, %v1884_v20  ;;  %v1199_v28 = vsel %vm161_vm0, %v1190_v36, %v1186_v15 }
  0xf7   : > { %v1135_v60 = vsel %vm167_vm2, %v1132_v45, %v1134_v40  ;;  %v507_v2 = vsel %vm167_vm2, %v504_v26, %v506_v9  ;;  %v1156_v3 = vsel %vm164_vm1, %v1150_v1, %v1155_v57  ;;  %v1176_v12 = vrot.slane %v2152_v29, %v1886_v21 }
  0xf8   : > { %v529_v8 = vsel %vm167_vm2, %v526_v42, %v528_v7  ;;  %v1178_v13 = vsel %vm164_vm1, %v1172_v51, %v1177_v43  ;;  %v551_v56 = vsel %vm167_vm2, %v548_v14, %v550_v41  ;;  %v1198_v0 = vrot.slane %v2152_v29, %v1942_v48 }
  0xf9   : > { %1136 = vrot.lane.b32.xlu1 %v1135_v60, %s1669_s4  ;;  %508 = vrot.lane.b32.xlu0 %v507_v2, %s1667_s26  ;;  %v1208_v26 = vrot.slane %v2184_v50, %v1882_v19  ;;  %v1230_v58 = vrot.slane %v2184_v50, %v1884_v20  ;;  %v1200_v61 = vsel %vm164_vm1, %v1194_v16, %v1199_v28 }
  0xfa   : > { %v570_v15 = vrot.slane %v1968_v59, %v1884_v20  ;;  %v1252_v9 = vrot.slane %v2184_v50, %v1886_v21  ;;  %v1157_v29 = vsel %vm167_vm2, %v1154_v17, %v1156_v3  ;;  %v572_v37 = vsel %vm164_vm1, %v566_v10, %v2003_v11 }
  0xfb   : > { %v1212_v36 = vrot.slane %v2213_v46, %v1882_v19  ;;  %v1179_v6 = vsel %vm167_vm2, %v1176_v12, %v1178_v13  ;;  %v588_v45 = vrot.slane %v1900_v27, %v1886_v21  ;;  %v592_v1 = vrot.slane %v1968_v59, %v1886_v21 }
  0xfc   : > { %v593_v42 = vsel %vm161_vm0, %v584_v62, %v580_v55  ;;  %v2264_v10 = vcombine.high %v2234_v25, %v2234_v25  ;;  %v1201_v11 = vsel %vm167_vm2, %v1198_v0, %v1200_v61  ;;  %v650_v40 = vrot.slane %v2026_v33, %v1884_v20 }
  0xfd   : > { %1158 = vrot.lane.b32.xlu1 %v1157_v29, %s1670_s5  ;;  %v654_v57 = vrot.slane %v1938_v47, %v1884_v20  ;;  %530 = vrot.lane.b32.xlu0 %v529_v8, %s1668_s2  ;;  %v573_v51 = vsel %vm167_vm2, %v570_v15, %v572_v37  ;;  %v658_v55 = vrot.slane %v2209_v52, %v1884_v20  ;;  %s2447_s2 = scalar_lea.hbm %s2502_s1, %s1428_s10 }
  0xfe   : > { %v694_v62 = vrot.slane %v2026_v33, %v1942_v48  ;;  %v698_v14 = vrot.slane %v1938_v47, %v1942_v48  ;;  %v1216_v7 = vrot.slane %v2234_v25, %v1882_v19  ;;  %v1221_v43 = vsel %vm161_vm0, %v1212_v36, %v1208_v26 }
  0xff   : > { %v659_v41 = vsel %vm161_vm0, %v650_v40, %v646_v38  ;;  %v672_v16 = vrot.slane %v2026_v33, %v1886_v21  ;;  %v676_v60 = vrot.slane %v1938_v47, %v1886_v21  ;;  %v680_v2 = vrot.slane %v2209_v52, %v1886_v21 }
 0x100   : > { %v660_v17 = vsel %vm164_vm1, %v654_v57, %v659_v41  ;;  %v703_v28 = vsel %vm161_vm0, %v694_v62, %v690_v34  ;;  %v366_v12 = vrot.slane %v1892_v23, %v1882_v19  ;;  %v1234_v8 = vrot.slane %v2213_v46, %v1884_v20 }
 0x101   : > { %1180 = vrot.lane.b32.xlu1 %v1179_v6, %s1671_s14  ;;  %v2299_v38 = vsel %vm167_vm2, %v658_v55, %v660_v17  ;;  %v2302_v3 = vsel %vm164_vm1, %v698_v14, %v703_v28  ;;  %v681_v34 = vsel %vm161_vm0, %v672_v16, %v668_v39  ;;  %552 = vrot.lane.b32.xlu0 %v551_v56, %s1669_s4  ;;  %s1316_s4 = scalar_lea.sflag [#allocation4], %s1814_s24 }
 0x102   : > { %v682_v13 = vsel %vm164_vm1, %v676_v60, %v681_v34  ;;  %v374_v0 = vrot.slane %v1910_v31, %v1882_v19  ;;  %v950_v26 = vrot.slane %v1954_v53, %v1882_v19  ;;  %v606_v61 = vrot.slane %v1934_v44, %v1942_v48 }
 0x103   : > { %v683_v39 = vsel %vm167_vm2, %v680_v2, %v682_v13  ;;  %v375_v23 = vsel %vm161_vm0, %v366_v12, %v362_v24  ;;  %v958_v56 = vrot.slane %v1989_v4, %v1882_v19  ;;  %v1220_v15 = vrot.slane %v2264_v10, %v1882_v19 }
 0x104   : > { %v594_v31 = vsel %vm164_vm1, %v588_v45, %v593_v42  ;;  %v376_v44 = vsel %vm164_vm1, %v370_v32, %v375_v23  ;;  %v959_v22 = vsel %vm161_vm0, %v950_v26, %v946_v54  ;;  %v1222_v24 = vsel %vm164_vm1, %v1216_v7, %v1221_v43 }
 0x105   : > { %1202 = vrot.lane.b32.xlu1 %v1201_v11, %s1672_s23  ;;  %v1238_v53 = vrot.slane %v2234_v25, %v1884_v20  ;;  %v2343_v4 = vsel %vm167_vm2, %v374_v0, %v376_v44  ;;  %v960_v30 = vsel %vm164_vm1, %v954_v5, %v959_v22  ;;  %574 = vrot.lane.b32.xlu0 %v573_v51, %s1670_s5  ;;  %s1558_s5 = scalar_lea.vmem %s2449_s19, 128 }
 0x106   : > { %v1243_v32 = vsel %vm161_vm0, %v1234_v8, %v1230_v58  ;;  %v1256_v54 = vrot.slane %v2213_v46, %v1886_v21  ;;  %v2356_v29 = vsel %vm167_vm2, %v958_v56, %v960_v30  ;;  %v2509_v37 = vrot.slane %v1880_v18, %v1942_v48  ;;  %p1559_p8 = scmp.ne.s32.totalorder %s2449_s19, %s1558_s5 }
 0x107   : > { %v628_v5 = vrot.slane %v2026_v33, %v1882_v19  ;;  %v624_v58 = vrot.slane %v1917_v35, %v1882_v19  ;;  %v1274_v27 = vrot.slane %v2184_v50, %v1942_v48  ;;  %v1223_v36 = vsel %vm167_vm2, %v1220_v15, %v1222_v24 }
 0x108   : > { %v615_v63 = vsel %vm161_vm0, %v606_v61, %v2509_v37  ;;  %v1242_v6 = vrot.slane %v2264_v10, %v1884_v20  ;;  %v595_v18 = vsel %vm167_vm2, %v592_v1, %v594_v31  ;;  %v1244_v45 = vsel %vm164_vm1, %v1238_v53, %v1243_v32  ;;  %p1560_p12 = pnand %p1559_p8, %p2510_p9 }
 0x109   : > { %1224 = vrot.lane.b32.xlu1 %v1223_v36, %s1673_s20  ;;  %v614_v33 = vrot.slane %v1968_v59, %v1942_v48  ;;  %v1260_v35 = vrot.slane %v2234_v25, %v1886_v21  ;;  %596 = vrot.lane.b32.xlu0 %v595_v18, %s1671_s14  ;;  %v616_v42 = vsel %vm164_vm1, %v610_v49, %v615_v63  ;;  %s1677_s14 = smov [#allocation5]  }
 0x10a   : > { %v1265_v20 = vsel %vm161_vm0, %v1256_v54, %v1252_v9  ;;  %v632_v1 = vrot.slane %v1938_v47, %v1882_v19  ;;  %v1278_v11 = vrot.slane %v2213_v46, %v1942_v48  ;;  %v637_v59 = vsel %vm161_vm0, %v628_v5, %v624_v58  ;;  %p1561_p0 = pneg %p1560_p12 }
 0x10b   : > { %v1245_v40 = vsel %vm167_vm2, %v1242_v6, %v1244_v45  ;;  %v1264_v57 = vrot.slane %v2264_v10, %v1886_v21  ;;  %v617_v51 = vsel %vm167_vm2, %v614_v33, %v616_v42  ;;  %v1266_v50 = vsel %vm164_vm1, %v1260_v35, %v1265_v20 }
 0x10c   : > { %v636_v9 = vrot.slane %v2209_v52, %v1882_v19  ;;  %v1282_v47 = vrot.slane %v2234_v25, %v1942_v48  ;;  %v638_v46 = vsel %vm164_vm1, %v632_v1, %v637_v59  ;;  %v1287_v55 = vsel %vm161_vm0, %v1278_v11, %v1274_v27 }
 0x10d   : > { %1246 = vrot.lane.b32.xlu1 %v1245_v40, %s1674_s28  ;;  %618 = vrot.lane.b32.xlu0 %v617_v51, %s1672_s23  ;;  %v1267_v21 = vsel %vm167_vm2, %v1264_v57, %v1266_v50  ;;  %v1286_v62 = vrot.slane %v2264_v10, %v1942_v48  ;;  %v702_v7 = vrot.slane %v2209_v52, %v1942_v48  ;;  %vm735_vm0 = vcmask 457728   ;;  %s1562_s23 = sshll.u32 %s1677_s14, 4  ;;  %s1563_s23 = int_to_ptr.vmem [resolvable:$false] %s1562_s23 }
 0x10e   : > { %v639_v14 = vsel %vm167_vm2, %v636_v9, %v638_v46  ;;  %v1288_v19 = vsel %vm164_vm1, %v1282_v47, %v1287_v55  ;;  %vm737_vm1 = vcmask 490496   ;;  %p1565_p11 = scmp.lt.s32.totalorder %s2449_s19, %s1563_s23 }
 0x10f   : > { %v1289_v25 = vsel %vm167_vm2, %v1286_v62, %v1288_v19  ;;  %v705_v43 = vsel %vm167_vm2, %v702_v7, %v2302_v3  ;;  %vm1311_vm2 = vcmask 1043456  }
 0x111   : > { %1268 = vrot.lane.b32.xlu1 %v1267_v21, %s1675_s29  ;;  %640 = vrot.lane.b32.xlu0 %v639_v14, %s1673_s20  ;;  %s1564_s20 = scalar_lea.vmem %s1563_s23, 256 }
 0x112   : > { %p1566_p13 = scmp.lt.s32.totalorder %s1564_s20, %s1558_s5 }
 0x114   : > { %p1567_p1 = por %p1566_p13, %p1565_p11 }
 0x115   : > { %1290 = vrot.lane.b32.xlu1 %v1289_v25, %s1676_s30  ;;  %662 = vrot.lane.b32.xlu0 %v2299_v38, %s1674_s28 }
 0x116   : > { %p1568_p4 = pnand %p1567_p1, %p1561_p0 }
 0x119   : > { %706 = vrot.lane.b32.xlu1 %v705_v43, %s1676_s30  ;;  %684 = vrot.lane.b32.xlu0 %v683_v39, %s1675_s29 }
 0x145   : > { %v399_v10 = vpop.permute.xlu0 %398 }
 0x146   : > { %v421_v16 = vpop.permute.xlu1 %420  ;;  %v710_v24 = vsel %vm709_vm3, %v2343_v4, %v399_v10 }
 0x147   : > { %v712_v54 = vsel %vm711_vm5, %v710_v24, %v421_v16 }
 0x153   : > { %v983_v41 = vpop.permute.xlu0 %982 }
 0x154   : > { %v1293_v56 = vsel %vm709_vm3, %v2356_v29, %v983_v41  ;;  %vm1313_vm3 = vcmask 523264  }
 0x157   : > { %v1005_v17 = vpop.permute.xlu0 %1004 }
 0x158   : > { %v1294_v15 = vsel %vm711_vm5, %v1293_v56, %v1005_v17 }
 0x15b   : > { %v1049_v28 = vpop.permute.xlu1 %1048  ;;  %v1027_v60 = vpop.permute.xlu0 %1026 }
 0x15c   : > { %v1295_v44 = vsel %vm713_vm4, %v1294_v15, %v1027_v60 }
 0x15d   : > { %v1296_v53 = vsel %vm715_vm6, %v1295_v44, %v1049_v28 }
 0x15f   : > { %v1071_v2 = vpop.permute.xlu1 %1070  ;;  %v443_v34 = vpop.permute.xlu0 %442 }
 0x160   : > { %v1297_v32 = vsel %vm717_vm7, %v1296_v53, %v1071_v2  ;;  %v714_v37 = vsel %vm713_vm4, %v712_v54, %v443_v34 }
 0x163   : > { %v1093_v12 = vpop.permute.xlu1 %1092  ;;  %v465_v8 = vpop.permute.xlu0 %464 }
 0x164   : > { %v1298_v29 = vsel %vm719_vm8, %v1297_v32, %v1093_v12  ;;  %v716_v63 = vsel %vm715_vm6, %v714_v37, %v465_v8 }
 0x167   : > { %v1115_v48 = vpop.permute.xlu1 %1114  ;;  %v487_v52 = vpop.permute.xlu0 %486 }
 0x168   : > { %v1299_v4 = vsel %vm721_vm9, %v1298_v29, %v1115_v48  ;;  %v718_v27 = vsel %vm717_vm7, %v716_v63, %v487_v52 }
 0x16b   : > { %v1137_v13 = vpop.permute.xlu1 %1136  ;;  %v509_v0 = vpop.permute.xlu0 %508 }
 0x16c   : > { %v1300_v5 = vsel %vm723_vm10, %v1299_v4, %v1137_v13  ;;  %v720_v18 = vsel %vm719_vm8, %v718_v27, %v509_v0 }
 0x16f   : > { %v1159_v38 = vpop.permute.xlu1 %1158  ;;  %v531_v26 = vpop.permute.xlu0 %530 }
 0x170   : > { %v1301_v36 = vsel %vm725_vm11, %v1300_v5, %v1159_v38  ;;  %v722_v33 = vsel %vm721_vm9, %v720_v18, %v531_v26 }
 0x173   : > { %v1181_v61 = vpop.permute.xlu1 %1180  ;;  %v553_v3 = vpop.permute.xlu0 %552 }
 0x174   : > { %v1302_v45 = vsel %vm727_vm12, %v1301_v36, %v1181_v61  ;;  %v724_v42 = vsel %vm723_vm10, %v722_v33, %v553_v3 }
 0x177   : > { %v1203_v23 = vpop.permute.xlu1 %1202  ;;  %v575_v39 = vpop.permute.xlu0 %574 }
 0x178   : > { %v1303_v35 = vsel %vm729_vm13, %v1302_v45, %v1203_v23  ;;  %v726_v11 = vsel %vm725_vm11, %v724_v42, %v575_v39 }
 0x17b   : > { %v1225_v31 = vpop.permute.xlu1 %1224  ;;  %v597_v22 = vpop.permute.xlu0 %596 }
 0x17c   : > { %v1304_v20 = vsel %vm731_vm14, %v1303_v35, %v1225_v31  ;;  %v728_v57 = vsel %vm727_vm12, %v726_v11, %v597_v22 }
 0x17f   : > { %v1247_v30 = vpop.permute.xlu1 %1246  ;;  %v619_v49 = vpop.permute.xlu0 %618 }
 0x180   : > { %v1305_v59 = vsel %vm733_vm15, %v1304_v20, %v1247_v30  ;;  %v730_v50 = vsel %vm729_vm13, %v728_v57, %v619_v49 }
 0x183   : > { %v1269_v58 = vpop.permute.xlu1 %1268  ;;  %v641_v6 = vpop.permute.xlu0 %640 }
 0x184   : > { %v1306_v51 = vsel %vm735_vm0, %v1305_v59, %v1269_v58  ;;  %v732_v47 = vsel %vm731_vm14, %v730_v50, %v641_v6 }
 0x187   : > { %v1291_v1 = vpop.permute.xlu1 %1290  ;;  %v663_v40 = vpop.permute.xlu0 %662 }
 0x188   : > { %v1307_v9 = vsel %vm737_vm1, %v1306_v51, %v1291_v1  ;;  %v734_v55 = vsel %vm733_vm15, %v732_v47, %v663_v40 }
 0x189   : > { %v1309_v62 = vrot.slane %v1307_v9, 4 }
 0x18b   : > { %v707_v46 = vpop.permute.xlu1 %706  ;;  %v685_v21 = vpop.permute.xlu0 %684 }
 0x18c   : > { %v736_v14 = vsel %vm735_vm0, %v734_v55, %v685_v21 }
 0x18d   : > { %v738_v19 = vsel %vm737_vm1, %v736_v14, %v707_v46 }
 0x18e   : > { %v1312_v25 = vsel %vm1311_vm2, %v738_v19, %v1309_v62 }
 0x18f   : > { %1314 = vst.msk [vmem:[%s151_s18] sm:$0xff] %vm1313_vm3, %v1312_v25 }
 0x190   : > { %1571 = shalt.err (!%p1568_p4)
}
 0x191   : > { %s1572_s24 = scalar_lea.hbm %s2447_s2, 128  ;;  %s1576_s30 = scalar_lea.hbm %s2502_s1, 512 }
 0x192   : > { %p1573_p3 = scmp.ne.s32.totalorder %s2447_s2, %s1572_s24  ;;  %p1577_p2 = scmp.lt.u32.totalorder %s2447_s2, %s2502_s1 }
 0x193   : > { %p1578_p5 = scmp.lt.u32.totalorder %s1576_s30, %s1572_s24  ;;  %p1580_p8 = scmp.lt.u32.totalorder %s1572_s24, %s2447_s2 }
 0x194   : > { %p1574_p6 = pnand %p1573_p3, %p2510_p9 }
 0x195   : > { %p1579_p10 = por %p1578_p5, %p1577_p2 }
 0x196   : > { %p1575_p7 = pneg %p1574_p6 }
 0x197   : > { %p1581_p12 = por %p1580_p8, %p1579_p10 }
 0x199   : > { %p1582_p0 = pnand %p1581_p12, %p1575_p7 }
 0x19b   : > { %1585 = shalt.err (!%p1582_p0)
}
 0x19c   : > { %1433 = dma.vmem_to_hbm [thread:$0]  (%p2510_p9), %s2449_s19, 128, %s2447_s2, %s1316_s4  }
 0x19d PF: > { %p1444_p11 = scmp.ge.s32.totalorder %s1656_s13, 2  ;;  %s1343_s15 = sand.u32 1, %s1628_s6  }
 0x19e   : > { %p2511_p13 = scmp.ne.s32.totalorder %s2507_s25, 0  ;;  %s1344_s10 = scalar_lea.sflag [#allocation4], %s1343_s15 }
 0x1a0   : > { %p1440_p1 = pnand %p1444_p11, %p2511_p13 }
 0x1a2   : > { %1623 = dma.done.wait (!%p1440_p1), %s1344_s10, 128  }
 0x1a3   : > { %1625 = vsyncadd (!%p1440_p1), %s1344_s10, 4294967168  ;;  %s17_s13 = sadd.s32 1, %s1656_s13   ;;  %s2512_s6 = smov %s1632_s7 }
 0x1a4   : > { %p14_p4 = scmp.ge.s32.totalorder %s17_s13, 6   ;;  %s2513_s7 = smov %s1636_s8 }
 0x1a5   : > { %s2514_s8 = smov %s1766_s27  ;;  %s2515_s9 = smov %s1648_s11 }
 0x1a6   : > { %s2516_s10 = smov %s1652_s12  ;;  %s2517_s11 = smov %s2520_s16 }
 0x1a7   : > { %s2518_s12 = smov %s2524_s17  ;;  %16 = sbr.rel (!%p14_p4) target bundleno = 7 (0x7), region = 69 }
 0x1ae   :  { %1349 = vsyncpa [#allocation3], 1 }
 0x1af   :  { %1351 = vsyncpa [#allocation3 + $0x1], 1 }
 0x1b0   :  { %1352 = vsyncpa [#allocation4], 1 }
 0x1b1   :  { %1354 = vsyncpa [#allocation4 + $0x1], 1 }

</bundles_post_ra>
